<compile_context>
chip_gen: v6e
topology: v6e:2x2x1
jax: 0.10.0
libtpu: 0.0.40
codegen_flags: <defaults>
</compile_context>

<pallas_src>
import math

import jax
import jax.numpy as jnp
from jax.experimental import pallas as pl
from jax.experimental.pallas import tpu as pltpu


_DEFAULT_TARGET_BYTES = 4 << 20       # ~4 MiB video block: roofline plateau,
                                      # 2x(in)+2x(out) buffers ~16 MiB.
_VMEM_LIMIT_BYTES = 32 << 20          # valid on v5e/v6e/v7x physical VMEM.
_MEGACORE_SPLIT_MIN_BYTES = 1 << 20   # force >=2 blocks only past this size.


def _normalize_kernel(scale_ref, shift_ref, x_ref, o_ref):
    # out = x * scale + shift; scale/shift are (block_rows, 1) and broadcast
    # across the lane (column) dimension. They arrive already in the compute
    # dtype (f32, or the video dtype for bf16/f16), so this is a single VPU
    # fused multiply-add per vreg with no extra casts for 16-bit videos.
    o_ref[...] = (x_ref[...] * scale_ref[...] + shift_ref[...]).astype(o_ref.dtype)


def _sublane_packing(dtype):
    """Rows per native sublane tile: 8 for 4-byte, 16 for 2-byte, 32 for 1-byte."""
    return 8 * max(1, 4 // jnp.dtype(dtype).itemsize)


def _choose_block_shape(num_rows, num_cols, itemsize, row_packing, target_bytes):
    """Pick a (block_rows, block_cols) tile of ~target_bytes satisfying the
    TPU tiling rule (each dim a multiple of its packing/128, or the full extent)."""
    # Columns: keep the full lane-dense width only when a `row_packing`-row
    # slab already fits the byte target; otherwise chunk to a multiple of 128
    # and let Pallas mask the single ragged trailing block.
    if row_packing * num_cols * itemsize <= target_bytes:
        block_cols = num_cols
    else:
        block_cols = (target_bytes // (row_packing * itemsize)) // 128 * 128
        block_cols = int(min(max(128, block_cols), num_cols))

    # Rows: full extent, or a multiple of the dtype's sublane packing sized
    # toward the target (ragged trailing row block is masked).
    rows_fit = max(1, target_bytes // (block_cols * itemsize))
    if rows_fit >= num_rows or num_rows <= row_packing:
        block_rows = num_rows
    else:
        block_rows = max(row_packing, (rows_fit // row_packing) * row_packing)
    return block_rows, block_cols


def _maybe_split_single_block(block_rows, block_cols, num_rows, num_cols,
                              itemsize, row_packing):
    """If one block would cover a non-trivial array, split it so v7x's two
    TensorCores each get work (a harmless extra grid step on v5e/v6e)."""
    total_bytes = num_rows * num_cols * itemsize
    if (block_rows < num_rows or block_cols < num_cols
            or total_bytes < _MEGACORE_SPLIT_MIN_BYTES):
        return block_rows, block_cols
    half_rows = -(-num_rows // 2)
    half_rows = -(-half_rows // row_packing) * row_packing
    if half_rows < num_rows:
        return half_rows, block_cols
    half_cols = -(-num_cols // 2)
    half_cols = -(-half_cols // 128) * 128
    if half_cols < num_cols:
        return block_rows, half_cols
    return block_rows, block_cols


def pallas_normalize_video(video, mean, std, *, donate=False,
                           target_bytes=_DEFAULT_TARGET_BYTES):
    """video: (..., C, H, W) floating array; mean/std: (C,) arrays."""
    if not jnp.issubdtype(video.dtype, jnp.floating):
        # torchvision Normalize requires a float tensor; refuse silent truncation.
        raise TypeError(f"Normalize expects a floating-point video, got {video.dtype}")

    *lead, C, H, W = video.shape
    N = math.prod(lead) if lead else 1
    R = N * C
    HW = H * W

    # Fold (x - mean) / std -> x * scale + shift. Constants are derived in
    # float32; for 16-bit videos they are cast once to the video dtype so the
    # in-kernel FMA runs natively in bf16/f16 (matches torchvision, which
    # casts mean/std to the tensor dtype).
    mean32 = jnp.asarray(mean, dtype=jnp.float32)
    std32 = jnp.asarray(std, dtype=jnp.float32)
    scale = 1.0 / std32                 # (C,)
    shift = -mean32 / std32             # (C,)
    if video.dtype in (jnp.dtype(jnp.bfloat16), jnp.dtype(jnp.float16)):
        compute_dtype = video.dtype
    else:
        compute_dtype = jnp.float32
    scale_rows = jnp.tile(scale, N).reshape(R, 1).astype(compute_dtype)   # (R, 1)
    shift_rows = jnp.tile(shift, N).reshape(R, 1).astype(compute_dtype)   # (R, 1)

    x2d = video.reshape(R, HW)
    itemsize = jnp.dtype(video.dtype).itemsize
    row_packing = _sublane_packing(video.dtype)
    block_rows, block_cols = _choose_block_shape(R, HW, itemsize, row_packing,
                                                 target_bytes)
    block_rows, block_cols = _maybe_split_single_block(
        block_rows, block_cols, R, HW, itemsize, row_packing)
    # Row axis outermost, column axis innermost: the (block_rows, 1)
    # scale/shift blocks keep the same block index across the inner loop and
    # are not re-DMA'd every step.
    grid = (pl.cdiv(R, block_rows), pl.cdiv(HW, block_cols))

    extra_kwargs = {}
    if donate:
        # Video 2-D input (arg index 2) aliases the output: no second
        # full-size HBM allocation when the caller donates the buffer.
        extra_kwargs["input_output_aliases"] = {2: 0}

    out2d = pl.pallas_call(
        _normalize_kernel,
        out_shape=jax.ShapeDtypeStruct((R, HW), video.dtype),
        grid=grid,
        in_specs=[
            pl.BlockSpec((block_rows, 1), lambda i, j: (i, 0)),           # scale
            pl.BlockSpec((block_rows, 1), lambda i, j: (i, 0)),           # shift
            pl.BlockSpec((block_rows, block_cols), lambda i, j: (i, j)),  # video
        ],
        out_specs=pl.BlockSpec((block_rows, block_cols), lambda i, j: (i, j)),
        compiler_params=pltpu.CompilerParams(
            dimension_semantics=("parallel", "parallel"),
            vmem_limit_bytes=_VMEM_LIMIT_BYTES),
        **extra_kwargs,
    )(scale_rows, shift_rows, x2d)

    return out2d.reshape(video.shape)


class Normalize:
    """Mirrors the PyTorch module: returns sample_dict with
    sample_dict['video'] normalized per channel."""

    def __init__(self, mean, std):
        self.mean = jnp.asarray(mean, dtype=jnp.float32)
        self.std = jnp.asarray(std, dtype=jnp.float32)

    def __call__(self, sample_dict):
        sample_dict = dict(sample_dict)
        sample_dict['video'] = pallas_normalize_video(
            sample_dict['video'], self.mean, self.std)
        return sample_dict


if __name__ == "__main__":
    key = jax.random.PRNGKey(0)
    k1, k2, k3, k4 = jax.random.split(key, 4)

    # Case 1: small (frames, C, H, W) f32 video through the module interface.
    mean4 = jnp.array([0.485, 0.456, 0.406, 0.45], dtype=jnp.float32)
    std4 = jnp.array([0.229, 0.224, 0.225, 0.25], dtype=jnp.float32)
    video = jax.random.uniform(k1, (2, 4, 16, 16), dtype=jnp.float32)
    module = Normalize(mean4, std4)
    sample = {'video': video, 'label': jnp.int32(1)}
    out = module(sample)
    out_video = jax.block_until_ready(out['video'])
    ref = (video - mean4[None, :, None, None]) / std4[None, :, None, None]
    assert out_video.shape == video.shape and out_video.dtype == video.dtype
    assert jnp.allclose(out_video, ref, atol=1e-5, rtol=1e-5)
    assert out['label'] == sample['label']

    mean3 = jnp.array([0.485, 0.456, 0.406], dtype=jnp.float32)
    std3 = jnp.array([0.229, 0.224, 0.225], dtype=jnp.float32)

    # Case 2: ragged H*W (not a 128 multiple) and rows not a multiple of 8 —
    # full-extent block path.
    video2 = jax.random.uniform(k2, (2, 3, 8, 10), dtype=jnp.float32)
    out2 = jax.block_until_ready(pallas_normalize_video(video2, mean3, std3))
    ref2 = (video2 - mean3[None, :, None, None]) / std3[None, :, None, None]
    assert jnp.allclose(out2, ref2, atol=1e-5, rtol=1e-5)

    # Case 3: force column chunking (128-multiple blocks + masked ragged
    # trailing column block) with a small byte target.
    video3 = jax.random.uniform(k3, (2, 3, 40, 40), dtype=jnp.float32)
    out3 = jax.block_until_ready(
        pallas_normalize_video(video3, mean3, std3, target_bytes=32 * 1024))
    ref3 = (video3 - mean3[None, :, None, None]) / std3[None, :, None, None]
    assert jnp.allclose(out3, ref3, atol=1e-5, rtol=1e-5)

    # Case 4: bf16 video — 16-row sublane packing, native bf16 FMA, ragged
    # trailing (masked) row and column blocks.
    video4 = jax.random.uniform(k4, (8, 3, 16, 32),
                                dtype=jnp.float32).astype(jnp.bfloat16)
    out4 = jax.block_until_ready(
        pallas_normalize_video(video4, mean3, std3, target_bytes=8 * 1024))
    ref4 = ((video4.astype(jnp.float32) - mean3[None, :, None, None])
            / std3[None, :, None, None])
    assert out4.dtype == jnp.bfloat16
    assert jnp.allclose(out4.astype(jnp.float32), ref4, atol=1e-1, rtol=5e-2)

    print("KERNEL_OK")
</pallas_src>

<mosaic_0001>
module attributes {stable_mosaic.version = 11 : i64} {
  func.func @_normalize_kernel(%arg0: i32, %arg1: i32, %arg2: memref<8x1xf32, #tpu.memory_space<vmem>>, %arg3: memref<8x1xf32, #tpu.memory_space<vmem>>, %arg4: memref<8x256xf32, #tpu.memory_space<vmem>>, %arg5: memref<8x256xf32, #tpu.memory_space<vmem>>) attributes {dimension_semantics = [#tpu.dimension_semantics<parallel>, #tpu.dimension_semantics<parallel>], iteration_bounds = array<i64: 1, 1>, scalar_prefetch = 0 : i64, scratch_operands = 0 : i64, tpu.core_type = #tpu.core_type<tc>, window_params = [{transform_indices = @transform_0, window_bounds = array<i64: 8, 1>}, {transform_indices = @transform_1, window_bounds = array<i64: 8, 1>}, {transform_indices = @transform_2, window_bounds = array<i64: 8, 256>}, {transform_indices = @transform_3, window_bounds = array<i64: 8, 256>}]} {
    %c0 = arith.constant 0 : index
    %c0_0 = arith.constant 0 : index
    %0 = vector.load %arg4[%c0, %c0_0] : memref<8x256xf32, #tpu.memory_space<vmem>>, vector<8x256xf32>
    %c0_1 = arith.constant 0 : index
    %c0_2 = arith.constant 0 : index
    %1 = vector.load %arg2[%c0_1, %c0_2] : memref<8x1xf32, #tpu.memory_space<vmem>>, vector<8x1xf32>
    %2 = vector.broadcast %1 : vector<8x1xf32> to vector<8x256xf32>
    %3 = arith.mulf %0, %2 : vector<8x256xf32>
    %c0_3 = arith.constant 0 : index
    %c0_4 = arith.constant 0 : index
    %4 = vector.load %arg3[%c0_3, %c0_4] : memref<8x1xf32, #tpu.memory_space<vmem>>, vector<8x1xf32>
    %5 = vector.broadcast %4 : vector<8x1xf32> to vector<8x256xf32>
    %6 = arith.addf %3, %5 : vector<8x256xf32>
    %c0_5 = arith.constant 0 : index
    %c0_6 = arith.constant 0 : index
    %7 = vector.load %arg5[%c0_5, %c0_6] : memref<8x256xf32, #tpu.memory_space<vmem>>, vector<8x256xf32>
    tpu.vector_store %arg5[%c0_5, %c0_6], %6 {strides = array<i32>} : memref<8x256xf32, #tpu.memory_space<vmem>>, vector<8x256xf32>,
    return
  }
  func.func @transform_0(%arg0: i32, %arg1: i32) -> (i32, i32) {
    %c0_i32 = arith.constant 0 : i32
    %c0_i32_0 = arith.constant 0 : i32
    return %arg0, %c0_i32 : i32, i32
  }
  func.func @transform_1(%arg0: i32, %arg1: i32) -> (i32, i32) {
    %c0_i32 = arith.constant 0 : i32
    %c0_i32_0 = arith.constant 0 : i32
    return %arg0, %c0_i32 : i32, i32
  }
  func.func @transform_2(%arg0: i32, %arg1: i32) -> (i32, i32) {
    %c0_i32 = arith.constant 0 : i32
    return %arg0, %arg1 : i32, i32
  }
  func.func @transform_3(%arg0: i32, %arg1: i32) -> (i32, i32) {
    %c0_i32 = arith.constant 0 : i32
    return %arg0, %arg1 : i32, i32
  }
}

</mosaic_0001>

<bundles_post_ra>
// kernel: tpu_custom_call.1
= control target key start
LH: loop header
LB: loop body
LE: loop exit
PB: predicated region body
PF: predicated region fallthrough
CT: control target
= control target key end

     0   :  { %v74_v1 = vmov 0   ;;  %s111_s0 = inlined_call_operand.vmem [shape: f32[8,1], index: 0, kind: input, shape index: {}]   ;;  %s112_s1 = inlined_call_operand.vmem [shape: f32[8,1], index: 1, kind: input, shape index: {}]   ;;  %s113_s2 = inlined_call_operand.vmem [shape: f32[8,256], index: 2, kind: input, shape index: {}]   ;;  %s114_s3 = inlined_call_operand.hbm [shape: f32[8,256], index: 3, kind: output, shape index: {}]  }
   0x1   :  { %v17_v0 = vld [vmem:[%s111_s0] sm:$0xff]  ;;  %51 = vset.pattern.permute.xlu0 %v74_v1 }
   0x2   :  { %8 = vsyncpa [#allocation3], 0  ;;  %20 = vperm.xlu0 %51, %v17_v0   ;;  %v25_v2 = vld [vmem:[%s112_s1] sm:$0xff]  ;;  %v16_v5 = vld [vmem:[%s113_s2 + $0x8] sm:$0xff]  ;;  %s75_s20 = smov [#allocation2]  }
   0x3   :  { %v15_v4 = vld [vmem:[%s113_s2] sm:$0xff]  ;;  %s41_s0 = sshll.u32 %s75_s20, 4  ;;  %s42_s0 = int_to_ptr.vmem [resolvable:$true] %s41_s0 }
   0x4   :  { %s52_s1 = scalar_lea.vmem %s42_s0, 256  ;;  %p57_p1 = scmp.lt.s32.totalorder %s42_s0, %s42_s0 }
   0x5   :  { %p53_p0 = scmp.ne.s32.totalorder %s42_s0, %s52_s1  ;;  %p58_p2 = scmp.lt.s32.totalorder %s52_s1, %s52_s1 }
   0x6   :  { %28 = vperm.xlu0 %51, %v25_v2  }
   0x7   :  { %p59_p3 = por %p58_p2, %p57_p1 }
   0x9   :  { %p60_p4 = pnand %p59_p3, %p53_p0 }
  0x7d   :  { %v21_v3 = vpop.permute.xlu0 %20 }
  0x7e   :  { %v23_v6 = vmul.f32 %v21_v3, %v15_v4  ;;  %v24_v7 = vmul.f32 %v21_v3, %v16_v5 }
  0x81   :  { %v29_v8 = vpop.permute.xlu0 %28 }
  0x82   :  { %v31_v9 = vadd.f32 %v29_v8, %v23_v6  ;;  %v32_v10 = vadd.f32 %v29_v8, %v24_v7 }
  0x84   :  { %33 = vst [vmem:[#allocation2] sm:$0xff] %v31_v9  ;;  %34 = vst [vmem:[#allocation2 + $0x8] sm:$0xff] %v32_v10 }
  0x85   :  { %63 = shalt.err (!%p60_p4)
}
  0x86   :  { %44 = dma.vmem_to_hbm [thread:$0]  %s42_s0, 256, %s114_s3, [#allocation3]  }
  0x87   :  { %72 = dma.done.wait [#allocation3], 256  }
  0x88   :  { %73 = vsyncadd [#allocation3], 4294967040 }
  0x89   :  { %48 = vsyncpa [#allocation3], 1 }

</bundles_post_ra>
